<compile_context>
chip_gen: v7x
topology: tpu7x:2x2x1
jax: 0.10.0
libtpu: 0.0.40
codegen_flags: <defaults>
</compile_context>

<pallas_src>
import functools

import jax
import jax.numpy as jnp
from jax.experimental import pallas as pl
from jax.experimental.pallas import tpu as pltpu


LANE = 128      # lane width of a vreg (last dim)
SUBLANE = 8     # sublane width of a vreg (second-to-last dim)


def _round_up(x, m):
    return (x + m - 1) // m * m


# ---------------------------------------------------------------------------
# Fused kernel: the full MLP stack for one row tile.
# ---------------------------------------------------------------------------
def _fused_mlp_kernel(x_ref, w_ref, b_ref, o_ref, h_ref, *, kinds):
    # x_ref: [tm, P]            row tile of the (padded) input
    # w_ref: [L, P, P]          stacked, zero-padded weights (x @ W layout)
    # b_ref: [L, 1, P]          stacked, zero-padded biases
    # o_ref: [tm, P]            row tile of the (padded) output
    # h_ref: [tm, P] f32 VMEM   activation scratch, reused across layers
    h_ref[...] = x_ref[...].astype(jnp.float32)
    for l, kind in enumerate(kinds):  # static, unrolled; l is a static index
        acc = jnp.dot(h_ref[...], w_ref[l],
                      preferred_element_type=jnp.float32)
        acc = acc + b_ref[l].astype(jnp.float32)
        if kind == "block":           # MLP_Block: relu(linear(x)) + x
            acc = jnp.maximum(acc, 0.0) + h_ref[...]
        h_ref[...] = acc
    o_ref[...] = h_ref[...].astype(o_ref.dtype)


# ---------------------------------------------------------------------------
# Wrapper: pad to lane-dense width, row-tile, call the fused kernel once.
# ---------------------------------------------------------------------------
def fused_mlp_forward(x2d, w_stack, b_stack, kinds, out_dim, *, tm_max=512):
    """x2d: [N, Din]; w_stack: [L, P, P]; b_stack: [L, 1, P] -> [N, out_dim]."""
    n, din = x2d.shape
    num_layers, p, _ = w_stack.shape

    # Row tile: largest multiple of 8 up to tm_max; pad rows to a multiple.
    tm = min(tm_max, _round_up(n, SUBLANE))
    n_pad = _round_up(n, tm)

    # Zero-pad rows and feature lanes (padded lanes stay exactly zero
    # throughout the stack because W rows/cols and bias are zero-padded).
    x_pad = jnp.zeros((n_pad, p), x2d.dtype).at[:n, :din].set(x2d)

    grid = (n_pad // tm,)
    itemsize = jnp.dtype(x2d.dtype).itemsize
    flops = 2 * n_pad * p * p * num_layers
    bytes_accessed = (x_pad.size + w_stack.size + b_stack.size
                      + n_pad * p) * itemsize

    kernel = functools.partial(_fused_mlp_kernel, kinds=tuple(kinds))
    out_pad = pl.pallas_call(
        kernel,
        out_shape=jax.ShapeDtypeStruct((n_pad, p), x2d.dtype),
        grid=grid,
        in_specs=[
            pl.BlockSpec((tm, p), lambda i: (i, 0)),                 # x tile
            pl.BlockSpec((num_layers, p, p), lambda i: (0, 0, 0)),   # W resident
            pl.BlockSpec((num_layers, 1, p), lambda i: (0, 0, 0)),   # b resident
        ],
        out_specs=pl.BlockSpec((tm, p), lambda i: (i, 0)),           # lane-dense
        scratch_shapes=[pltpu.VMEM((tm, p), jnp.float32)],
        compiler_params=pltpu.CompilerParams(
            dimension_semantics=("parallel",),
            vmem_limit_bytes=32 * 1024 * 1024,
        ),
        cost_estimate=pl.CostEstimate(
            flops=flops, transcendentals=0, bytes_accessed=bytes_accessed),
    )(x_pad, w_stack, b_stack)
    return out_pad[:n, :out_dim]


# ---------------------------------------------------------------------------
# Parameter construction (deterministic, PyTorch-Linear-style uniform init)
# ---------------------------------------------------------------------------
def _init_linear(key, in_dim, out_dim, dtype=jnp.float32):
    kw, kb = jax.random.split(key)
    bound = 1.0 / jnp.sqrt(jnp.float32(in_dim))
    w = jax.random.uniform(kw, (in_dim, out_dim), dtype, -bound, bound)
    b = jax.random.uniform(kb, (1, out_dim), dtype, -bound, bound)
    return w, b


class MLPLayerPallas:
    """JAX/Pallas re-implementation of MLP_Layer (inference semantics)."""

    def __init__(self, input_dim, hidden_dims, output_dim, dropout, key,
                 dtype=jnp.float32):
        del dropout  # identity in eval mode / p == 0
        self.output_dim = output_dim

        kinds = []
        raw = []              # unpadded (w, b) for the jnp reference
        in_dim = input_dim
        for hidden_dim in hidden_dims:
            key, sub = jax.random.split(key)
            w, b = _init_linear(sub, in_dim, hidden_dim, dtype)
            kinds.append("block" if in_dim == hidden_dim else "linear")
            raw.append((w, b))
            in_dim = hidden_dim
        key, sub = jax.random.split(key)
        w, b = _init_linear(sub, in_dim, output_dim, dtype)
        kinds.append("linear")
        raw.append((w, b))

        self.kinds = tuple(kinds)
        self.raw_params = raw

        # Common lane-dense padded width for all layers.
        dims = [input_dim] + list(hidden_dims) + [output_dim]
        p = _round_up(max(dims), LANE)
        self.padded_dim = p

        w_pads, b_pads = [], []
        for w, b in raw:
            wp = jnp.zeros((p, p), dtype).at[:w.shape[0], :w.shape[1]].set(w)
            bp = jnp.zeros((1, p), dtype).at[:, :b.shape[1]].set(b)
            w_pads.append(wp)
            b_pads.append(bp)
        self.w_stack = jnp.stack(w_pads)   # [L, P, P]
        self.b_stack = jnp.stack(b_pads)   # [L, 1, P]

    def __call__(self, x):
        # x: [..., input_dim]
        lead_shape = x.shape[:-1]
        h = x.reshape((-1, x.shape[-1]))
        out = fused_mlp_forward(h, self.w_stack, self.b_stack,
                                self.kinds, self.output_dim)
        return out.reshape(lead_shape + (self.output_dim,))

    # pure-jnp reference for verification
    def reference(self, x):
        lead_shape = x.shape[:-1]
        h = x.reshape((-1, x.shape[-1]))
        for kind, (w, b) in zip(self.kinds, self.raw_params):
            y = h @ w + b
            h = jnp.maximum(y, 0.0) + h if kind == "block" else y
        return h.reshape(lead_shape + (h.shape[-1],))


# ---------------------------------------------------------------------------
# Demo
# ---------------------------------------------------------------------------
if __name__ == "__main__":
    key = jax.random.PRNGKey(0)
    k_param, k_x = jax.random.split(key)

    input_dim = 32
    hidden_dims = [32, 64, 64]   # 32->32 block, 32->64 linear, 64->64 block
    output_dim = 16
    batch, seq = 2, 8

    model = MLPLayerPallas(input_dim, hidden_dims, output_dim,
                           dropout=0.0, key=k_param)

    x = jax.random.normal(k_x, (batch, seq, input_dim), dtype=jnp.float32)

    out = model(x)
    out = jax.block_until_ready(out)

    ref = model.reference(x)
    assert out.shape == (batch, seq, output_dim)
    assert jnp.allclose(out, ref, atol=1e-5, rtol=1e-5)

    print("KERNEL_OK")
</pallas_src>

<mosaic_0001>
module attributes {stable_mosaic.version = 11 : i64} {
  func.func @_fused_mlp_kernel(%arg0: i32, %arg1: memref<16x128xf32, #tpu.memory_space<vmem>>, %arg2: memref<4x128x128xf32, #tpu.memory_space<vmem>>, %arg3: memref<4x1x128xf32, #tpu.memory_space<vmem>>, %arg4: memref<16x128xf32, #tpu.memory_space<vmem>>, %arg5: memref<16x128xf32, #tpu.memory_space<vmem>>) attributes {dimension_semantics = [#tpu.dimension_semantics<parallel>], iteration_bounds = array<i64: 1>, scalar_prefetch = 0 : i64, scratch_operands = 1 : i64, tpu.core_type = #tpu.core_type<tc>, window_params = [{transform_indices = @transform_0, window_bounds = array<i64: 16, 128>}, {pipeline_mode = #tpu.pipeline_mode<synchronous>, transform_indices = @transform_1, window_bounds = array<i64: 4, 128, 128>}, {pipeline_mode = #tpu.pipeline_mode<synchronous>, transform_indices = @transform_2, window_bounds = array<i64: 4, 1, 128>}, {transform_indices = @transform_3, window_bounds = array<i64: 16, 128>}]} {
    %c0 = arith.constant 0 : index
    %c0_0 = arith.constant 0 : index
    %0 = vector.load %arg1[%c0, %c0_0] : memref<16x128xf32, #tpu.memory_space<vmem>>, vector<16x128xf32>
    %c0_1 = arith.constant 0 : index
    %c0_2 = arith.constant 0 : index
    %1 = vector.load %arg5[%c0_1, %c0_2] : memref<16x128xf32, #tpu.memory_space<vmem>>, vector<16x128xf32>
    tpu.vector_store %arg5[%c0_1, %c0_2], %0 {strides = array<i32>} : memref<16x128xf32, #tpu.memory_space<vmem>>, vector<16x128xf32>,
    %c0_3 = arith.constant 0 : index
    %c0_4 = arith.constant 0 : index
    %2 = vector.load %arg5[%c0_3, %c0_4] : memref<16x128xf32, #tpu.memory_space<vmem>>, vector<16x128xf32>
    %c0_5 = arith.constant 0 : index
    %c0_6 = arith.constant 0 : index
    %c0_7 = arith.constant 0 : index
    %3 = vector.load %arg2[%c0_5, %c0_6, %c0_7] : memref<4x128x128xf32, #tpu.memory_space<vmem>>, vector<1x128x128xf32>
    %4 = vector.shape_cast %3 : vector<1x128x128xf32> to vector<128x128xf32>
    %cst = arith.constant dense<0.000000e+00> : vector<16x128xf32>
    %5 = tpu.matmul %2, %4, %cst {dimension_numbers = #tpu.dot_dimension_numbers<[1], [0], [0], [1], [0, 0, 1, 1], [], []>} : vector<16x128xf32>, vector<128x128xf32>, vector<16x128xf32> -> vector<16x128xf32>
    %c0_8 = arith.constant 0 : index
    %c0_9 = arith.constant 0 : index
    %c0_10 = arith.constant 0 : index
    %6 = vector.load %arg3[%c0_8, %c0_9, %c0_10] : memref<4x1x128xf32, #tpu.memory_space<vmem>>, vector<1x1x128xf32>
    %7 = vector.shape_cast %6 : vector<1x1x128xf32> to vector<1x128xf32>
    %8 = vector.broadcast %7 : vector<1x128xf32> to vector<16x128xf32>
    %9 = arith.addf %5, %8 : vector<16x128xf32>
    %cst_11 = arith.constant 0.000000e+00 : f32
    %10 = vector.broadcast %cst_11 : f32 to vector<16x128xf32>
    %11 = arith.maximumf %9, %10 : vector<16x128xf32>
    %c0_12 = arith.constant 0 : index
    %c0_13 = arith.constant 0 : index
    %12 = vector.load %arg5[%c0_12, %c0_13] : memref<16x128xf32, #tpu.memory_space<vmem>>, vector<16x128xf32>
    %13 = arith.addf %11, %12 : vector<16x128xf32>
    %c0_14 = arith.constant 0 : index
    %c0_15 = arith.constant 0 : index
    %14 = vector.load %arg5[%c0_14, %c0_15] : memref<16x128xf32, #tpu.memory_space<vmem>>, vector<16x128xf32>
    tpu.vector_store %arg5[%c0_14, %c0_15], %13 {strides = array<i32>} : memref<16x128xf32, #tpu.memory_space<vmem>>, vector<16x128xf32>,
    %c0_16 = arith.constant 0 : index
    %c0_17 = arith.constant 0 : index
    %15 = vector.load %arg5[%c0_16, %c0_17] : memref<16x128xf32, #tpu.memory_space<vmem>>, vector<16x128xf32>
    %c1 = arith.constant 1 : index
    %c0_18 = arith.constant 0 : index
    %c0_19 = arith.constant 0 : index
    %16 = vector.load %arg2[%c1, %c0_18, %c0_19] : memref<4x128x128xf32, #tpu.memory_space<vmem>>, vector<1x128x128xf32>
    %17 = vector.shape_cast %16 : vector<1x128x128xf32> to vector<128x128xf32>
    %cst_20 = arith.constant dense<0.000000e+00> : vector<16x128xf32>
    %18 = tpu.matmul %15, %17, %cst_20 {dimension_numbers = #tpu.dot_dimension_numbers<[1], [0], [0], [1], [0, 0, 1, 1], [], []>} : vector<16x128xf32>, vector<128x128xf32>, vector<16x128xf32> -> vector<16x128xf32>
    %c1_21 = arith.constant 1 : index
    %c0_22 = arith.constant 0 : index
    %c0_23 = arith.constant 0 : index
    %19 = vector.load %arg3[%c1_21, %c0_22, %c0_23] : memref<4x1x128xf32, #tpu.memory_space<vmem>>, vector<1x1x128xf32>
    %20 = vector.shape_cast %19 : vector<1x1x128xf32> to vector<1x128xf32>
    %21 = vector.broadcast %20 : vector<1x128xf32> to vector<16x128xf32>
    %22 = arith.addf %18, %21 : vector<16x128xf32>
    %c0_24 = arith.constant 0 : index
    %c0_25 = arith.constant 0 : index
    %23 = vector.load %arg5[%c0_24, %c0_25] : memref<16x128xf32, #tpu.memory_space<vmem>>, vector<16x128xf32>
    tpu.vector_store %arg5[%c0_24, %c0_25], %22 {strides = array<i32>} : memref<16x128xf32, #tpu.memory_space<vmem>>, vector<16x128xf32>,
    %c0_26 = arith.constant 0 : index
    %c0_27 = arith.constant 0 : index
    %24 = vector.load %arg5[%c0_26, %c0_27] : memref<16x128xf32, #tpu.memory_space<vmem>>, vector<16x128xf32>
    %c2 = arith.constant 2 : index
    %c0_28 = arith.constant 0 : index
    %c0_29 = arith.constant 0 : index
    %25 = vector.load %arg2[%c2, %c0_28, %c0_29] : memref<4x128x128xf32, #tpu.memory_space<vmem>>, vector<1x128x128xf32>
    %26 = vector.shape_cast %25 : vector<1x128x128xf32> to vector<128x128xf32>
    %cst_30 = arith.constant dense<0.000000e+00> : vector<16x128xf32>
    %27 = tpu.matmul %24, %26, %cst_30 {dimension_numbers = #tpu.dot_dimension_numbers<[1], [0], [0], [1], [0, 0, 1, 1], [], []>} : vector<16x128xf32>, vector<128x128xf32>, vector<16x128xf32> -> vector<16x128xf32>
    %c2_31 = arith.constant 2 : index
    %c0_32 = arith.constant 0 : index
    %c0_33 = arith.constant 0 : index
    %28 = vector.load %arg3[%c2_31, %c0_32, %c0_33] : memref<4x1x128xf32, #tpu.memory_space<vmem>>, vector<1x1x128xf32>
    %29 = vector.shape_cast %28 : vector<1x1x128xf32> to vector<1x128xf32>
    %30 = vector.broadcast %29 : vector<1x128xf32> to vector<16x128xf32>
    %31 = arith.addf %27, %30 : vector<16x128xf32>
    %cst_34 = arith.constant 0.000000e+00 : f32
    %32 = vector.broadcast %cst_34 : f32 to vector<16x128xf32>
    %33 = arith.maximumf %31, %32 : vector<16x128xf32>
    %c0_35 = arith.constant 0 : index
    %c0_36 = arith.constant 0 : index
    %34 = vector.load %arg5[%c0_35, %c0_36] : memref<16x128xf32, #tpu.memory_space<vmem>>, vector<16x128xf32>
    %35 = arith.addf %33, %34 : vector<16x128xf32>
    %c0_37 = arith.constant 0 : index
    %c0_38 = arith.constant 0 : index
    %36 = vector.load %arg5[%c0_37, %c0_38] : memref<16x128xf32, #tpu.memory_space<vmem>>, vector<16x128xf32>
    tpu.vector_store %arg5[%c0_37, %c0_38], %35 {strides = array<i32>} : memref<16x128xf32, #tpu.memory_space<vmem>>, vector<16x128xf32>,
    %c0_39 = arith.constant 0 : index
    %c0_40 = arith.constant 0 : index
    %37 = vector.load %arg5[%c0_39, %c0_40] : memref<16x128xf32, #tpu.memory_space<vmem>>, vector<16x128xf32>
    %c3 = arith.constant 3 : index
    %c0_41 = arith.constant 0 : index
    %c0_42 = arith.constant 0 : index
    %38 = vector.load %arg2[%c3, %c0_41, %c0_42] : memref<4x128x128xf32, #tpu.memory_space<vmem>>, vector<1x128x128xf32>
    %39 = vector.shape_cast %38 : vector<1x128x128xf32> to vector<128x128xf32>
    %cst_43 = arith.constant dense<0.000000e+00> : vector<16x128xf32>
    %40 = tpu.matmul %37, %39, %cst_43 {dimension_numbers = #tpu.dot_dimension_numbers<[1], [0], [0], [1], [0, 0, 1, 1], [], []>} : vector<16x128xf32>, vector<128x128xf32>, vector<16x128xf32> -> vector<16x128xf32>
    %c3_44 = arith.constant 3 : index
    %c0_45 = arith.constant 0 : index
    %c0_46 = arith.constant 0 : index
    %41 = vector.load %arg3[%c3_44, %c0_45, %c0_46] : memref<4x1x128xf32, #tpu.memory_space<vmem>>, vector<1x1x128xf32>
    %42 = vector.shape_cast %41 : vector<1x1x128xf32> to vector<1x128xf32>
    %43 = vector.broadcast %42 : vector<1x128xf32> to vector<16x128xf32>
    %44 = arith.addf %40, %43 : vector<16x128xf32>
    %c0_47 = arith.constant 0 : index
    %c0_48 = arith.constant 0 : index
    %45 = vector.load %arg5[%c0_47, %c0_48] : memref<16x128xf32, #tpu.memory_space<vmem>>, vector<16x128xf32>
    tpu.vector_store %arg5[%c0_47, %c0_48], %44 {strides = array<i32>} : memref<16x128xf32, #tpu.memory_space<vmem>>, vector<16x128xf32>,
    %c0_49 = arith.constant 0 : index
    %c0_50 = arith.constant 0 : index
    %46 = vector.load %arg5[%c0_49, %c0_50] : memref<16x128xf32, #tpu.memory_space<vmem>>, vector<16x128xf32>
    %c0_51 = arith.constant 0 : index
    %c0_52 = arith.constant 0 : index
    %47 = vector.load %arg4[%c0_51, %c0_52] : memref<16x128xf32, #tpu.memory_space<vmem>>, vector<16x128xf32>
    tpu.vector_store %arg4[%c0_51, %c0_52], %46 {strides = array<i32>} : memref<16x128xf32, #tpu.memory_space<vmem>>, vector<16x128xf32>,
    return
  }
  func.func @transform_0(%arg0: i32) -> (i32, i32) {
    %c0_i32 = arith.constant 0 : i32
    %c0_i32_0 = arith.constant 0 : i32
    return %arg0, %c0_i32 : i32, i32
  }
  func.func @transform_1(%arg0: i32) -> (i32, i32, i32) {
    %c0_i32 = arith.constant 0 : i32
    %c0_i32_0 = arith.constant 0 : i32
    %c0_i32_1 = arith.constant 0 : i32
    %c0_i32_2 = arith.constant 0 : i32
    return %c0_i32, %c0_i32_0, %c0_i32_1 : i32, i32, i32
  }
  func.func @transform_2(%arg0: i32) -> (i32, i32, i32) {
    %c0_i32 = arith.constant 0 : i32
    %c0_i32_0 = arith.constant 0 : i32
    %c0_i32_1 = arith.constant 0 : i32
    %c0_i32_2 = arith.constant 0 : i32
    return %c0_i32, %c0_i32_0, %c0_i32_1 : i32, i32, i32
  }
  func.func @transform_3(%arg0: i32) -> (i32, i32) {
    %c0_i32 = arith.constant 0 : i32
    %c0_i32_0 = arith.constant 0 : i32
    return %arg0, %c0_i32 : i32, i32
  }
}

</mosaic_0001>

<bundles_post_ra>
// kernel: tpu_custom_call.1
= control target key start
LH: loop header
LB: loop body
LE: loop exit
PB: predicated region body
PF: predicated region fallthrough
CT: control target
= control target key end

     0   :  { %8 = vsyncpa [#allocation4], 0  ;;  %s1001_s0 = inlined_call_operand.hbm [shape: f32[16,128], index: 0, kind: input, shape index: {}]   ;;  %s1002_s1 = inlined_call_operand.hbm [shape: f32[4,128,128], index: 1, kind: input, shape index: {}]   ;;  %s1003_s2 = inlined_call_operand.vmem [shape: f32[4,1,128], index: 2, kind: input, shape index: {}]   ;;  %s1004_s3 = inlined_call_operand.hbm [shape: f32[16,128], index: 3, kind: output, shape index: {}]  }
   0x1   :  { %9 = vsyncpa [#allocation7], 0 }
   0x2   :  { %10 = vsyncpa [#allocation5], 0  ;;  %s915_s12 = smov [#allocation3]   ;;  %s843_s16 = scalar_lea.hbm %s1001_s0, 256 }
   0x3   :  { %s16_s13 = sshll.u32 %s915_s12, 4  ;;  %p844_p0 = scmp.ne.s32.totalorder %s1001_s0, %s843_s16  ;;  %s17_s13 = int_to_ptr.vmem [resolvable:$true] %s16_s13 }
   0x4   :  { %p847_p1 = scmp.lt.u32.totalorder %s843_s16, %s1001_s0 }
   0x6   :  { %p849_p2 = pnand %p847_p1, %p844_p0 }
   0x8   :  { %852 = shalt.err (!%p849_p2)
}
   0x9   :  { %s853_s21 = scalar_lea.vmem %s17_s13, 256  ;;  %p858_p4 = scmp.lt.s32.totalorder %s17_s13, %s17_s13 }
   0xa   :  { %p854_p3 = scmp.ne.s32.totalorder %s17_s13, %s853_s21  ;;  %p859_p5 = scmp.lt.s32.totalorder %s853_s21, %s853_s21 }
   0xc   :  { %p860_p6 = por %p859_p5, %p858_p4 }
   0xe   :  { %p861_p7 = pnand %p860_p6, %p854_p3 }
  0x10   :  { %864 = shalt.err (!%p861_p7)
}
  0x11   :  { %s916_s22 = smov 128   ;;  %s917_s23 = smov 8  }
  0x12   :  { %22 = dma.hbm_to_vmem [thread:$0]  %s1001_s0, 256, %s17_s13, [#allocation4], %s916_s22, %s916_s22, %s917_s23  }
  0x13   :  { %s918_s26 = smov [#allocation6]   ;;  %s865_s30 = scalar_lea.hbm %s1002_s1, 8192 }
  0x14   :  { %s28_s27 = sshll.u32 %s918_s26, 4  ;;  %p866_p8 = scmp.ne.s32.totalorder %s1002_s1, %s865_s30  ;;  %s29_s27 = int_to_ptr.vmem [resolvable:$true] %s28_s27 }
  0x15   :  { %p869_p9 = scmp.lt.u32.totalorder %s865_s30, %s1002_s1 }
  0x17   :  { %p871_p10 = pnand %p869_p9, %p866_p8 }
  0x19   :  { %874 = shalt.err (!%p871_p10)
}
  0x1a   :  { %s875_s8 = scalar_lea.vmem %s29_s27, 8192  ;;  %p880_p12 = scmp.lt.s32.totalorder %s29_s27, %s29_s27 }
  0x1b   :  { %p876_p11 = scmp.ne.s32.totalorder %s29_s27, %s875_s8  ;;  %p881_p13 = scmp.lt.s32.totalorder %s875_s8, %s875_s8 }
  0x1d   :  { %p882_p0 = por %p881_p13, %p880_p12 }
  0x1f   :  { %p883_p1 = pnand %p882_p0, %p876_p11 }
  0x21   :  { %886 = shalt.err (!%p883_p1)
}
  0x22   :  { %34 = dma.hbm_to_vmem [thread:$0]  %s1002_s1, 8192, %s29_s27, [#allocation7], %s916_s22, %s916_s22, %s917_s23  }
  0x23   :  { %909 = dma.done.wait [#allocation4], 256  }
  0x24   :  { %910 = vsyncadd [#allocation4], 4294967040 }
  0x25   :  { %911 = dma.done.wait [#allocation7], 8192  }
  0x26   :  { %912 = vsyncadd [#allocation7], 4294959104  ;;  %v49_v0 = vld [vmem:[#allocation6] sm:$0xff]  ;;  %v50_v1 = vld [vmem:[#allocation6 + $0x8] sm:$0xff]  ;;  %s919_s17 = smov [#allocation8]  }
  0x27   :  { %v51_v2 = vld [vmem:[#allocation6 + $0x10] sm:$0xff]  ;;  %v710_v3 = vpack.c.bf16 %v50_v1, %v49_v0  ;;  %v52_v4 = vld [vmem:[#allocation6 + $0x18] sm:$0xff]  ;;  %v53_v6 = vld [vmem:[#allocation6 + $0x20] sm:$0xff]  ;;  %s478_s18 = sshll.u32 %s919_s17, 4  ;;  %s479_s18 = int_to_ptr.vmem [resolvable:$true] %s478_s18 }
  0x28   :  { %v714_v5 = vpack.c.bf16 %v52_v4, %v51_v2  ;;  %v54_v7 = vld [vmem:[#allocation6 + $0x28] sm:$0xff]  ;;  %v55_v9 = vld [vmem:[#allocation6 + $0x30] sm:$0xff]  ;;  %v56_v10 = vld [vmem:[#allocation6 + $0x38] sm:$0xff]  ;;  %s887_s19 = scalar_lea.vmem %s479_s18, 256  ;;  %p892_p3 = scmp.lt.s32.totalorder %s479_s18, %s479_s18 }
  0x29   :  { %711 = vmatprep.subr.bf16.mxu0 %v710_v3  ;;  %v718_v8 = vpack.c.bf16 %v54_v7, %v53_v6  ;;  %v970_v11 = vld [vmem:[#allocation3] sm:$0xff]  ;;  %v156_v12 = vld [vmem:[#allocation6 + $0x80] sm:$0xff]  ;;  %v157_v13 = vld [vmem:[#allocation6 + $0x88] sm:$0xff]  ;;  %v722_v20 = vpack.c.bf16 %v56_v10, %v55_v9  ;;  %p888_p2 = scmp.ne.s32.totalorder %s479_s18, %s887_s19  ;;  %p893_p4 = scmp.lt.s32.totalorder %s887_s19, %s887_s19 }
  0x2a   :  { %713 = vmatpush3.bf16.msra.mxu0 %v710_v3  ;;  %602 = vmatprep.mubr.f32.mxu0 %v970_v11  ;;  %v158_v14 = vld [vmem:[#allocation6 + $0x90] sm:$0xff]  ;;  %v742_v15 = vpack.c.bf16 %v157_v13, %v156_v12  ;;  %v159_v16 = vld [vmem:[#allocation6 + $0x98] sm:$0xff]  ;;  %v160_v18 = vld [vmem:[#allocation6 + $0xa0] sm:$0xff] }
  0x2b   :  { %715 = vmatprep.subr.bf16.mxu0 %v714_v5  ;;  %v746_v17 = vpack.c.bf16 %v159_v16, %v158_v14  ;;  %v161_v19 = vld [vmem:[#allocation6 + $0xa8] sm:$0xff]  ;;  %v57_v21 = vld [vmem:[#allocation6 + $0x40] sm:$0xff]  ;;  %v162_v24 = vld [vmem:[#allocation6 + $0xb0] sm:$0xff]  ;;  %p894_p5 = por %p893_p4, %p892_p3 }
  0x2c   :  { %743 = vmatprep.subr.bf16.mxu1 %v742_v15  ;;  %v58_v22 = vld [vmem:[#allocation6 + $0x48] sm:$0xff]  ;;  %v750_v23 = vpack.c.bf16 %v161_v19, %v160_v18  ;;  %v163_v25 = vld [vmem:[#allocation6 + $0xb8] sm:$0xff]  ;;  %v59_v27 = vld [vmem:[#allocation6 + $0x50] sm:$0xff] }
  0x2d   :  { %745 = vmatpush3.bf16.msra.mxu1 %v742_v15  ;;  %v726_v26 = vpack.c.bf16 %v58_v22, %v57_v21  ;;  %v60_v28 = vld [vmem:[#allocation6 + $0x58] sm:$0xff]  ;;  %v754_v29 = vpack.c.bf16 %v163_v25, %v162_v24  ;;  %v164_v30 = vld [vmem:[#allocation6 + $0xc0] sm:$0xff]  ;;  %v165_v31 = vld [vmem:[#allocation6 + $0xc8] sm:$0xff]  ;;  %p895_p6 = pnand %p894_p5, %p888_p2 }
  0x2e   :  { %717 = vmatpush3.bf16.msra.mxu0 %v714_v5  ;;  %747 = vmatprep.subr.bf16.mxu1 %v746_v17  ;;  %v730_v32 = vpack.c.bf16 %v60_v28, %v59_v27  ;;  %v61_v33 = vld [vmem:[#allocation6 + $0x60] sm:$0xff]  ;;  %v62_v34 = vld [vmem:[#allocation6 + $0x68] sm:$0xff]  ;;  %v758_v35 = vpack.c.bf16 %v165_v31, %v164_v30  ;;  %v166_v36 = vld [vmem:[#allocation6 + $0xd0] sm:$0xff] }
  0x2f   :  { %719 = vmatprep.subr.bf16.mxu0 %v718_v8  ;;  %v167_v37 = vld [vmem:[#allocation6 + $0xd8] sm:$0xff]  ;;  %v734_v38 = vpack.c.bf16 %v62_v34, %v61_v33  ;;  %v63_v39 = vld [vmem:[#allocation6 + $0x70] sm:$0xff]  ;;  %v168_v44 = vld [vmem:[#allocation6 + $0xe0] sm:$0xff] }
  0x30   :  { %v64_v40 = vld [vmem:[#allocation6 + $0x78] sm:$0xff]  ;;  %v762_v41 = vpack.c.bf16 %v167_v37, %v166_v36  ;;  %v169_v45 = vld [vmem:[#allocation6 + $0xe8] sm:$0xff]  ;;  %v170_v47 = vld [vmem:[#allocation6 + $0xf0] sm:$0xff] }
  0x31   :  { %749 = vmatpush3.bf16.msra.mxu1 %v746_v17  ;;  %v738_v42 = vpack.c.bf16 %v64_v40, %v63_v39  ;;  %v44_v43 = vld [vmem:[#allocation3 + $0x8] sm:$0xff]  ;;  %v766_v46 = vpack.c.bf16 %v169_v45, %v168_v44  ;;  %v260_v50 = vld [vmem:[#allocation6 + $0x100] sm:$0xff]  ;;  %v261_v51 = vld [vmem:[#allocation6 + $0x108] sm:$0xff] }
  0x32   :  { %721 = vmatpush3.bf16.msra.mxu0 %v718_v8  ;;  %751 = vmatprep.subr.bf16.mxu1 %v750_v23  ;;  %v171_v48 = vld [vmem:[#allocation6 + $0xf8] sm:$0xff]  ;;  %v262_v52 = vld [vmem:[#allocation6 + $0x110] sm:$0xff]  ;;  %v774_v53 = vpack.c.bf16 %v261_v51, %v260_v50  ;;  %v264_v56 = vld [vmem:[#allocation6 + $0x120] sm:$0xff] }
  0x33   :  { %723 = vmatprep.subr.bf16.mxu0 %v722_v20  ;;  %v770_v49 = vpack.c.bf16 %v171_v48, %v170_v47  ;;  %v263_v54 = vld [vmem:[#allocation6 + $0x118] sm:$0xff]  ;;  %v265_v57 = vld [vmem:[#allocation6 + $0x128] sm:$0xff]  ;;  %v266_v59 = vld [vmem:[#allocation6 + $0x130] sm:$0xff] }
  0x34   :  { %v778_v55 = vpack.c.bf16 %v263_v54, %v262_v52  ;;  %v782_v58 = vpack.c.bf16 %v265_v57, %v264_v56  ;;  %v267_v60 = vld [vmem:[#allocation6 + $0x138] sm:$0xff]  ;;  %v268_v62 = vld [vmem:[#allocation6 + $0x140] sm:$0xff]  ;;  %v269_v63 = vld [vmem:[#allocation6 + $0x148] sm:$0xff] }
  0x35   :  { %753 = vmatpush3.bf16.msra.mxu1 %v750_v23  ;;  %v786_v61 = vpack.c.bf16 %v267_v60, %v266_v59  ;;  %v790_v0 = vpack.c.bf16 %v269_v63, %v268_v62  ;;  %v270_v1 = vld [vmem:[#allocation6 + $0x150] sm:$0xff]  ;;  %v271_v2 = vld [vmem:[#allocation6 + $0x158] sm:$0xff]  ;;  %v272_v4 = vld [vmem:[#allocation6 + $0x160] sm:$0xff] }
  0x36   :  { %725 = vmatpush3.bf16.msra.mxu0 %v722_v20  ;;  %755 = vmatprep.subr.bf16.mxu1 %v754_v29  ;;  %v794_v3 = vpack.c.bf16 %v271_v2, %v270_v1  ;;  %v273_v5 = vld [vmem:[#allocation6 + $0x168] sm:$0xff]  ;;  %v491_v7 = vld [vmem:[%s1003_s2] ss:$0 sm:$0xff]  ;;  %v275_v18 = vld [vmem:[#allocation6 + $0x178] sm:$0xff] }
  0x37   :  { %727 = vmatprep.subr.bf16.mxu0 %v726_v26  ;;  %v798_v6 = vpack.c.bf16 %v273_v5, %v272_v4  ;;  %v274_v17 = vld [vmem:[#allocation6 + $0x170] sm:$0xff]  ;;  %v368_v20 = vld [vmem:[#allocation6 + $0x180] sm:$0xff]  ;;  %v369_v21 = vld [vmem:[#allocation6 + $0x188] sm:$0xff] }
  0x38   :  { %v802_v19 = vpack.c.bf16 %v275_v18, %v274_v17  ;;  %v370_v22 = vld [vmem:[#allocation6 + $0x190] sm:$0xff]  ;;  %v806_v23 = vpack.c.bf16 %v369_v21, %v368_v20  ;;  %v371_v24 = vld [vmem:[#allocation6 + $0x198] sm:$0xff]  ;;  %v373_v27 = vld [vmem:[#allocation6 + $0x1a8] sm:$0xff] }
  0x39   :  { %757 = vmatpush3.bf16.msra.mxu1 %v754_v29  ;;  %v810_v25 = vpack.c.bf16 %v371_v24, %v370_v22  ;;  %v374_v28 = vld [vmem:[#allocation6 + $0x1b0] sm:$0xff]  ;;  %v375_v29 = vld [vmem:[#allocation6 + $0x1b8] sm:$0xff]  ;;  %v376_v31 = vld [vmem:[#allocation6 + $0x1c0] sm:$0xff] }
  0x3a   :  { %729 = vmatpush3.bf16.msra.mxu0 %v726_v26  ;;  %759 = vmatprep.subr.bf16.mxu1 %v758_v35  ;;  %v372_v26 = vld [vmem:[#allocation6 + $0x1a0] sm:$0xff]  ;;  %v818_v30 = vpack.c.bf16 %v375_v29, %v374_v28  ;;  %v378_v34 = vld [vmem:[#allocation6 + $0x1d0] sm:$0xff] }
  0x3b   :  { %731 = vmatprep.subr.bf16.mxu0 %v730_v32  ;;  %v493_v37 = vld [vmem:[%s1003_s2 + $0x1] ss:$0 sm:$0xff]  ;;  %v495_v48 = vld [vmem:[%s1003_s2 + $0x2] ss:$0 sm:$0xff]  ;;  %v497_v57 = vld [vmem:[%s1003_s2 + $0x3] ss:$0 sm:$0xff] }
  0x3c   :  { %v382_v45 = vld [vmem:[#allocation6 + $0x1f0] sm:$0xff] }
  0x3d   :  { %761 = vmatpush3.bf16.msra.mxu1 %v758_v35  ;;  %v379_v35 = vld [vmem:[#allocation6 + $0x1d8] sm:$0xff] }
  0x3e   :  { %733 = vmatpush3.bf16.msra.mxu0 %v730_v32  ;;  %763 = vmatprep.subr.bf16.mxu1 %v762_v41  ;;  %v377_v32 = vld [vmem:[#allocation6 + $0x1c8] sm:$0xff]  ;;  %v826_v36 = vpack.c.bf16 %v379_v35, %v378_v34 }
  0x3f   :  { %735 = vmatprep.subr.bf16.mxu0 %v734_v38  ;;  %v822_v33 = vpack.c.bf16 %v377_v32, %v376_v31 }
  0x41   :  { %765 = vmatpush3.bf16.msra.mxu1 %v762_v41 }
  0x42   :  { %737 = vmatpush3.bf16.msra.mxu0 %v734_v38  ;;  %767 = vmatprep.subr.bf16.mxu1 %v766_v46 }
  0x43   :  { %739 = vmatprep.subr.bf16.mxu0 %v738_v42 }
  0x45   :  { %769 = vmatpush3.bf16.msra.mxu1 %v766_v46  ;;  %v383_v46 = vld [vmem:[#allocation6 + $0x1f8] sm:$0xff] }
  0x46   :  { %741 = vmatpush3.bf16.msra.mxu0 %v738_v42  ;;  %771 = vmatprep.subr.bf16.mxu1 %v770_v49  ;;  %v380_v42 = vld [vmem:[#allocation6 + $0x1e0] sm:$0xff]  ;;  %v834_v47 = vpack.c.bf16 %v383_v46, %v382_v45 }
  0x47   :  { %775 = vmatprep.subr.bf16.mxu0 %v774_v53 }
  0x49   :  { %603 = vmatmul.mubr.f32.vlgmr.msra.gmra.mrb[0].mxu0 %v44_v43  ;;  %773 = vmatpush3.bf16.msra.mxu1 %v770_v49 }
  0x4a   :  { %777 = vmatpush3.bf16.msra.mxu0 %v774_v53  ;;  %807 = vmatprep.subr.bf16.mxu1 %v806_v23 }
  0x4b   :  { %779 = vmatprep.subr.bf16.mxu0 %v778_v55 }
  0x4e   :  { %781 = vmatpush3.bf16.msra.mxu0 %v778_v55 }
  0x4f   :  { %783 = vmatprep.subr.bf16.mxu0 %v782_v58 }
  0x52   :  { %785 = vmatpush3.bf16.msra.mxu0 %v782_v58 }
  0x53   :  { %787 = vmatprep.subr.bf16.mxu0 %v786_v61 }
  0x56   :  { %789 = vmatpush3.bf16.msra.mxu0 %v786_v61 }
  0x57   :  { %791 = vmatprep.subr.bf16.mxu0 %v790_v0 }
  0x5a   :  { %793 = vmatpush3.bf16.msra.mxu0 %v790_v0 }
  0x5b   :  { %795 = vmatprep.subr.bf16.mxu0 %v794_v3 }
  0x5e   :  { %797 = vmatpush3.bf16.msra.mxu0 %v794_v3 }
  0x5f   :  { %799 = vmatprep.subr.bf16.mxu0 %v798_v6 }
  0x62   :  { %801 = vmatpush3.bf16.msra.mxu0 %v798_v6 }
  0x63   :  { %803 = vmatprep.subr.bf16.mxu0 %v802_v19 }
  0x66   :  { %805 = vmatpush3.bf16.msra.mxu0 %v802_v19 }
 0x11c   :  { %v604_v8 = vpop.f32.mrb[0].mxu0 }
 0x11d   :  { %v144_v9 = vadd.f32 %v604_v8, %v491_v7  ;;  %v138_v10 = vpop.f32.mrb[1].mxu0 }
 0x11e   :  { %v139_v12 = vadd.f32 %v491_v7, %v138_v10 }
 0x11f   :  { %v148_v13 = vmax.f32 %v144_v9, 0.0 }
 0x120   :  { %v147_v14 = vmax.f32 %v139_v12, 0.0 }
 0x121   :  { %v150_v16 = vadd.f32 %v148_v13, %v44_v43  ;;  %v381_v43 = vld [vmem:[#allocation6 + $0x1e8] sm:$0xff] }
 0x122   :  { %v149_v15 = vadd.f32 %v147_v14, %v970_v11  ;;  %v814_v11 = vpack.c.bf16 %v373_v27, %v372_v26  ;;  %v830_v44 = vpack.c.bf16 %v381_v43, %v380_v42 }
 0x124   :  { %637 = vmatprep.mubr.f32.mxu1 %v149_v15 }
 0x125   :  { %638 = vmatmul.mubr.f32.vlgmr.msra.gmra.mrb[0].mxu1 %v150_v16 }
 0x126   :  { %809 = vmatpush3.bf16.msra.mxu1 %v806_v23 }
 0x127   :  { %811 = vmatprep.subr.bf16.mxu1 %v810_v25 }
 0x12a   :  { %813 = vmatpush3.bf16.msra.mxu1 %v810_v25 }
 0x12b   :  { %815 = vmatprep.subr.bf16.mxu1 %v814_v11 }
 0x12e   :  { %817 = vmatpush3.bf16.msra.mxu1 %v814_v11 }
 0x12f   :  { %819 = vmatprep.subr.bf16.mxu1 %v818_v30 }
 0x132   :  { %821 = vmatpush3.bf16.msra.mxu1 %v818_v30 }
 0x133   :  { %823 = vmatprep.subr.bf16.mxu1 %v822_v33 }
 0x136   :  { %825 = vmatpush3.bf16.msra.mxu1 %v822_v33 }
 0x137   :  { %827 = vmatprep.subr.bf16.mxu1 %v826_v36 }
 0x13a   :  { %829 = vmatpush3.bf16.msra.mxu1 %v826_v36 }
 0x13b   :  { %831 = vmatprep.subr.bf16.mxu1 %v830_v44 }
 0x13e   :  { %833 = vmatpush3.bf16.msra.mxu1 %v830_v44 }
 0x13f   :  { %835 = vmatprep.subr.bf16.mxu1 %v834_v47 }
 0x142   :  { %837 = vmatpush3.bf16.msra.mxu1 %v834_v47 }
 0x1f8   :  { %v639_v38 = vpop.f32.mrb[0].mxu1 }
 0x1f9   :  { %v246_v39 = vpop.f32.mrb[1].mxu1  ;;  %v252_v41 = vadd.f32 %v639_v38, %v493_v37 }
 0x1fa   :  { %v247_v40 = vadd.f32 %v493_v37, %v246_v39 }
 0x1fc   :  { %672 = vmatprep.mubr.f32.mxu0 %v247_v40 }
 0x1fd   :  { %673 = vmatmul.mubr.f32.vlgmr.msra.gmra.mrb[2].mxu0 %v252_v41 }
 0x2d0   :  { %v674_v49 = vpop.f32.mrb[2].mxu0 }
 0x2d1   :  { %v356_v50 = vadd.f32 %v674_v49, %v495_v48  ;;  %v350_v51 = vpop.f32.mrb[3].mxu0 }
 0x2d2   :  { %v351_v52 = vadd.f32 %v495_v48, %v350_v51 }
 0x2d3   :  { %v360_v53 = vmax.f32 %v356_v50, 0.0 }
 0x2d4   :  { %v359_v54 = vmax.f32 %v351_v52, 0.0 }
 0x2d5   :  { %v362_v56 = vadd.f32 %v360_v53, %v252_v41 }
 0x2d6   :  { %v361_v55 = vadd.f32 %v359_v54, %v247_v40 }
 0x2d8   :  { %707 = vmatprep.mubr.f32.mxu1 %v361_v55 }
 0x2d9   :  { %708 = vmatmul.mubr.f32.vlgmr.msra.gmra.mrb[2].mxu1 %v362_v56 }
 0x3ac   :  { %v709_v58 = vpop.f32.mrb[2].mxu1 }
 0x3ad   :  { %v464_v59 = vadd.f32 %v709_v58, %v497_v57  ;;  %v458_v60 = vpop.f32.mrb[3].mxu1 }
 0x3ae   :  { %v459_v61 = vadd.f32 %v497_v57, %v458_v60 }
 0x3af   :  { %472 = vst [vmem:[#allocation8 + $0x8] sm:$0xff] %v464_v59 }
 0x3b0   :  { %471 = vst [vmem:[#allocation8] sm:$0xff] %v459_v61 }
 0x3b1   :  { %898 = shalt.err (!%p895_p6)
}
 0x3b2   :  { %s899_s2 = scalar_lea.hbm %s1004_s3, 256 }
 0x3b3   :  { %p900_p7 = scmp.ne.s32.totalorder %s1004_s3, %s899_s2  ;;  %p903_p8 = scmp.lt.u32.totalorder %s899_s2, %s1004_s3 }
 0x3b5   :  { %p905_p9 = pnand %p903_p8, %p900_p7 }
 0x3b7   :  { %908 = shalt.err (!%p905_p9)
}
 0x3b8   :  { %484 = dma.vmem_to_hbm [thread:$0]  %s479_s18, 256, %s1004_s3, [#allocation5], %s916_s22, %s916_s22, %s917_s23  }
 0x3b9   :  { %913 = dma.done.wait [#allocation5], 256  }
 0x3ba   :  { %914 = vsyncadd [#allocation5], 4294967040 }
 0x3bb   :  { %488 = vsyncpa [#allocation4], 1 }
 0x3bc   :  { %489 = vsyncpa [#allocation7], 1 }
 0x3bd   :  { %490 = vsyncpa [#allocation5], 1 }

</bundles_post_ra>
